<compile_context>
chip_gen: v5e
topology: v5e:2x2
jax: 0.10.0
libtpu: 0.0.40
codegen_flags: <defaults>
</compile_context>

<pallas_src>
import jax
import jax.numpy as jnp
from jax.experimental import pallas as pl
from jax.experimental.pallas import tpu as pltpu

IN_FEATURES = 10
OUT_FEATURES = 2
LANES = 128   # one f32 vreg row
SUBLANES = 8  # one f32 vreg


def linear_kernel(slab_ref, o_ref):
    # slab_ref: (8, 128) f32 in VMEM.
    #   row 0, cols 0:10  = u, col 10 = 1.0            (augmented input)
    #   row j+1, cols 0:10 = W[j, :], col 10 = b[j]    (augmented weight rows)
    #   everything else is 0, so no masking is needed.
    # o_ref: (OUT_FEATURES, 1) f32.
    u_aug = slab_ref[0:1, :]                 # (1, 128)  VPU broadcast operand
    w_aug = slab_ref[1:1 + OUT_FEATURES, :]  # (2, 128)
    # VPU elementwise multiply + XLU lane reduction; no MXU fill/drain.
    o_ref[...] = jnp.sum(w_aug * u_aug, axis=1, keepdims=True)  # (2, 1)


@jax.jit
def my_model_forward(x, u, weight, bias):
    """Mirrors MyModel.forward: `x` is accepted but unused (as in the PyTorch code)."""
    del x  # PyTorch forward ignores its input

    # Pack u, W (native (2,10) layout, no transpose), and b into ONE vreg-sized slab.
    slab = jnp.zeros((SUBLANES, LANES), dtype=jnp.float32)
    slab = slab.at[0, :IN_FEATURES].set(u.astype(jnp.float32))
    slab = slab.at[0, IN_FEATURES].set(1.0)  # augmented "1" multiplying the bias column
    slab = slab.at[1:1 + OUT_FEATURES, :IN_FEATURES].set(weight.astype(jnp.float32))
    slab = slab.at[1:1 + OUT_FEATURES, IN_FEATURES].set(bias.astype(jnp.float32))

    out = pl.pallas_call(
        linear_kernel,
        out_shape=jax.ShapeDtypeStruct((OUT_FEATURES, 1), jnp.float32),
        in_specs=[pl.BlockSpec(memory_space=pltpu.VMEM)],
        out_specs=pl.BlockSpec(memory_space=pltpu.VMEM),
    )(slab)
    return out.reshape(OUT_FEATURES)


if __name__ == "__main__":
    key = jax.random.PRNGKey(0)
    k_u, k_w, k_b, k_x = jax.random.split(key, 4)

    # Deterministic stand-in for torch.rand(10): Uniform[0, 1)
    u = jax.random.uniform(k_u, (IN_FEATURES,), dtype=jnp.float32)

    # Deterministic Linear(10, 2) params (PyTorch default init: U(-1/sqrt(10), 1/sqrt(10)))
    bound = 1.0 / jnp.sqrt(jnp.float32(IN_FEATURES))
    weight = jax.random.uniform(
        k_w, (OUT_FEATURES, IN_FEATURES), dtype=jnp.float32, minval=-bound, maxval=bound
    )
    bias = jax.random.uniform(
        k_b, (OUT_FEATURES,), dtype=jnp.float32, minval=-bound, maxval=bound
    )

    # Example "text" input — ignored by forward, just as in the PyTorch module.
    x = jax.random.uniform(k_x, (IN_FEATURES,), dtype=jnp.float32)

    out = my_model_forward(x, u, weight, bias)
    jax.block_until_ready(out)

    # Reference check in plain JAX
    ref = weight @ u + bias
    assert out.shape == (OUT_FEATURES,)
    assert jnp.allclose(out, ref, atol=1e-5, rtol=1e-5)

    # TODO(synk): classify_text (random.choice over labels) and the task-dispatch
    # __call__ are host-side Python control flow, not kernel compute — omitted.
    print("KERNEL_OK")
</pallas_src>

<mosaic_0001>
module attributes {stable_mosaic.version = 11 : i64} {
  func.func @linear_kernel(%arg0: memref<8x128xf32, #tpu.memory_space<vmem>>, %arg1: memref<2x1xf32, #tpu.memory_space<vmem>>) attributes {dimension_semantics = [], scalar_prefetch = 0 : i64, scratch_operands = 0 : i64, tpu.core_type = #tpu.core_type<tc>} {
    %c0 = arith.constant 0 : index
    %c0_0 = arith.constant 0 : index
    %0 = vector.load %arg0[%c0, %c0_0] : memref<8x128xf32, #tpu.memory_space<vmem>>, vector<1x128xf32>
    %c1 = arith.constant 1 : index
    %c0_1 = arith.constant 0 : index
    %1 = vector.load %arg0[%c1, %c0_1] : memref<8x128xf32, #tpu.memory_space<vmem>>, vector<2x128xf32>
    %2 = vector.broadcast %0 : vector<1x128xf32> to vector<2x128xf32>
    %3 = arith.mulf %1, %2 : vector<2x128xf32>
    %cst = arith.constant dense<0.000000e+00> : vector<2xf32>
    %4 = vector.multi_reduction <add>, %3, %cst [1] : vector<2x128xf32> to vector<2xf32>
    %5 = vector.shape_cast %4 : vector<2xf32> to vector<2x1xf32>
    %c0_2 = arith.constant 0 : index
    %c0_3 = arith.constant 0 : index
    %6 = vector.load %arg1[%c0_2, %c0_3] : memref<2x1xf32, #tpu.memory_space<vmem>>, vector<2x1xf32>
    tpu.vector_store %arg1[%c0_2, %c0_3], %5 {strides = array<i32>} : memref<2x1xf32, #tpu.memory_space<vmem>>, vector<2x1xf32>,
    return
  }
}

</mosaic_0001>

<bundles_post_ra>
// kernel: my_model_forward.1
= control target key start
LH: loop header
LB: loop body
LE: loop exit
PB: predicated region body
PF: predicated region fallthrough
CT: control target
= control target key end

     0   :  { %vm12_vm0 = vcmask 1041408   ;;  %vm16_vm1 = vcmask 1024   ;;  %s42_s0 = inlined_call_operand.vmem [shape: f32[8,128], index: 0, kind: input, shape index: {}]   ;;  %s43_s1 = inlined_call_operand.vmem [shape: f32[2,1], index: 1, kind: output, shape index: {}]  }
   0x1   :  { %v9_v0 = vld [vmem:[%s42_s0 + $0x1] sm:$0x3]  ;;  %v22_v1 = vld [vmem:[%s42_s0] ss:$0 sm:$0xff] }
   0x2   :  { %v11_v2 = vmul.f32 %v22_v1, %v9_v0 }
   0x4   :  { %v13_v3 = vsel %vm12_vm0, %v11_v2, 0.0 }
   0x5   :  { %14 = vadd.xlane.f32.xlu0 %v13_v3 }
  0x78   :  { %v15_v4 = vpop.xlane.xlu0 %14 }
  0x79   :  { %17 = vst.msk [vmem:[%s43_s1] sm:$0x3] %vm16_vm1, %v15_v4 }

</bundles_post_ra>
